<compile_context>
chip_gen: v7x
topology: tpu7x:2x2x1
jax: 0.10.0
libtpu: 0.0.40
codegen_flags: <defaults>
</compile_context>

<pallas_src>
import jax
import jax.numpy as jnp
from jax import lax
from jax.experimental import pallas as pl
from jax.experimental.pallas import tpu as pltpu

_LANE = 128
# Conservative "whole table resident in VMEM" budget across v5e/v6e/v7x.
# TODO(synk): query pltpu.get_tpu_info() to pick this per generation.
_VMEM_TABLE_BUDGET = 12 << 20


def _round_up(x, m):
    return ((x + m - 1) // m) * m


def _sublane_multiple(dtype):
    # Packed sublane count per vreg: 8 for 4-byte, 16 for 2-byte, 32 for 1-byte.
    return max(8, 32 // jnp.dtype(dtype).itemsize)


# ----------------------------------------------------------------------------
# Kernel 1: VMEM-resident table, one-hot MXU gather.
# ----------------------------------------------------------------------------
def _label_embed_matmul_kernel(labels_ref, table_ref, out_ref):
    """labels_ref: [TB, 1] i32 (drop already merged); table_ref: [N, Hp];
    out_ref: [TB, Hp]."""
    labels = labels_ref[...]                                      # [TB, 1]
    tb = labels.shape[0]
    n = table_ref.shape[0]
    # One-hot built in the table dtype (keeps bf16 tables on the bf16 MXU
    # path); 0/1 entries + f32 accumulation keep the gather bit-exact.
    class_ids = lax.broadcasted_iota(jnp.int32, (tb, n), 1)       # [TB, N]
    one_hot = (class_ids == labels).astype(table_ref.dtype)       # [TB, N]
    emb = jnp.dot(one_hot, table_ref[...],
                  preferred_element_type=jnp.float32)             # [TB, Hp]
    out_ref[...] = emb.astype(out_ref.dtype)


# ----------------------------------------------------------------------------
# Kernel 2: HBM-resident table, per-row async-DMA gather.
# ----------------------------------------------------------------------------
def _label_embed_gather_kernel(labels_ref, table_hbm, out_ref, copy_sem):
    """labels_ref: [Bp] i32 in SMEM (scalar-prefetched, drop already merged);
    table_hbm: [N, Hp] ref in HBM (memory_space=pl.ANY); out_ref: [TB, Hp]
    VMEM output tile; copy_sem: DMA semaphore shared by this tile's copies."""
    tile = pl.program_id(0)
    tb = out_ref.shape[0]
    base = tile * tb

    def row_copy(r):
        return pltpu.make_async_copy(
            table_hbm.at[labels_ref[base + r]], out_ref.at[r], copy_sem)

    def start(r, carry):
        row_copy(r).start()
        return carry

    def wait(r, carry):
        row_copy(r).wait()
        return carry

    # Issue every row DMA for this tile, then drain them; the copies overlap
    # each other and the previous grid step's output writeback.
    lax.fori_loop(0, tb, start, 0)
    lax.fori_loop(0, tb, wait, 0)


# ----------------------------------------------------------------------------
# Wrapper
# ----------------------------------------------------------------------------
def pad_embedding_table(embedding_table):
    """Pad the hidden dim to a lane-dense multiple of 128.

    Call this ONCE at parameter-init time and pass the padded table to
    label_embedder_forward (with hidden_size=<original H>) so the per-call
    path never re-materializes an N x Hp copy of the table in HBM.
    """
    n, h = embedding_table.shape
    hp = max(_LANE, _round_up(h, _LANE))
    if hp == h:
        return embedding_table
    return jnp.pad(embedding_table, ((0, 0), (0, hp - h)))


def label_embedder_forward(labels, embedding_table, *, num_classes, dropout_prob,
                           train, rng=None, force_drop_ids=None,
                           hidden_size=None, block_b=256, use_hbm_gather=None):
    """Pallas-backed forward matching LabelEmbedder.forward semantics.

    labels:           int array [B]
    embedding_table:  [num_classes + use_cfg_embedding, H or Hp] (ideally
                      pre-padded via pad_embedding_table)
    hidden_size:      logical H (required if the table is pre-padded)
    Returns:          [B, H] in embedding_table.dtype
    """
    B = labels.shape[0]
    N, Hp_in = embedding_table.shape
    H = hidden_size if hidden_size is not None else Hp_in
    dtype = embedding_table.dtype
    itemsize = jnp.dtype(dtype).itemsize

    labels = labels.astype(jnp.int32)

    # --- token_drop (classifier-free guidance), plain XLA -------------------
    if (train and dropout_prob > 0) or (force_drop_ids is not None):
        if force_drop_ids is None:
            if rng is None:
                raise ValueError("rng is required for random label dropout")
            drop = jax.random.uniform(rng, (B,)) < dropout_prob
        else:
            drop = force_drop_ids == 1
        labels = jnp.where(drop, num_classes, labels)

    # PyTorch nn.Embedding raises on out-of-range ids; clamp instead of
    # silently producing zero rows through the one-hot / bad DMA addresses.
    labels = jnp.clip(labels, 0, N - 1)

    # --- lane-dense table columns (fallback pad; prefer pad_embedding_table) -
    Hp = max(_LANE, _round_up(Hp_in, _LANE))
    table = embedding_table
    if Hp != Hp_in:
        table = jnp.pad(embedding_table, ((0, 0), (0, Hp - Hp_in)))

    # --- batch tile: dtype-native sublane alignment + >=2 tiles for big B ---
    sub = _sublane_multiple(dtype)
    b_aligned = _round_up(B, sub)
    n_tiles = max(1, -(-b_aligned // block_b))
    if n_tiles == 1 and B >= 256:
        n_tiles = 2                      # keep both v7x TensorCores busy
    TB = _round_up(-(-b_aligned // n_tiles), sub)
    Bp = _round_up(B, TB)
    n_tiles = Bp // TB

    table_bytes = N * Hp * itemsize
    if use_hbm_gather is None:
        fits_vmem = table_bytes <= _VMEM_TABLE_BUDGET
        few_rows_needed = (N >= 8 * Bp) and (table_bytes >= (1 << 20))
        use_hbm_gather = (not fits_vmem) or few_rows_needed

    labels_padded = labels if Bp == B else jnp.pad(labels, (0, Bp - B))

    if use_hbm_gather:
        # ------------------- HBM row-gather path ----------------------------
        vmem_limit = int(min(max(2 * TB * Hp * itemsize + Bp * 4 + (2 << 20),
                                 8 << 20), 64 << 20))
        cost = pl.CostEstimate(
            flops=2 * Bp * Hp, transcendentals=0,
            bytes_accessed=2 * Bp * Hp * itemsize + Bp * 4)
        grid_spec = pltpu.PrefetchScalarGridSpec(
            num_scalar_prefetch=1,
            grid=(n_tiles,),
            in_specs=[pl.BlockSpec(memory_space=pl.ANY)],     # table stays in HBM
            out_specs=pl.BlockSpec((TB, Hp), lambda i, lbl: (i, 0)),
            scratch_shapes=[pltpu.SemaphoreType.DMA],
        )
        out = pl.pallas_call(
            _label_embed_gather_kernel,
            out_shape=jax.ShapeDtypeStruct((Bp, Hp), dtype),
            grid_spec=grid_spec,
            compiler_params=pltpu.CompilerParams(
                dimension_semantics=("parallel",),
                vmem_limit_bytes=vmem_limit),
            cost_estimate=cost,
        )(labels_padded, table)
        return out[:B, :H]

    # ---------------------- VMEM one-hot matmul path -------------------------
    labels2 = labels_padded.reshape(Bp, 1)
    vmem_needed = (2 * table_bytes            # covers non-Buffered(1) fallback
                   + 2 * TB * Hp * itemsize   # double-buffered output tile
                   + TB * N * itemsize        # in-kernel one-hot
                   + TB * Hp * 4              # f32 MXU accumulator
                   + 4 * TB * 4)              # labels tiles
    vmem_limit = int(min(max(vmem_needed + (2 << 20), 16 << 20), 64 << 20))
    # The kernel is a gather, not a GEMM: report memory-bound cost to XLA.
    cost = pl.CostEstimate(
        flops=2 * Bp * Hp, transcendentals=0,
        bytes_accessed=table_bytes + Bp * Hp * itemsize + Bp * 4)

    def run_matmul(table_pipeline_mode):
        spec_kwargs = {}
        if table_pipeline_mode is not None:
            spec_kwargs["pipeline_mode"] = table_pipeline_mode
        table_spec = pl.BlockSpec((N, Hp), lambda i: (0, 0), **spec_kwargs)
        return pl.pallas_call(
            _label_embed_matmul_kernel,
            out_shape=jax.ShapeDtypeStruct((Bp, Hp), dtype),
            grid=(n_tiles,),
            in_specs=[pl.BlockSpec((TB, 1), lambda i: (i, 0)), table_spec],
            out_specs=pl.BlockSpec((TB, Hp), lambda i: (i, 0)),
            compiler_params=pltpu.CompilerParams(
                dimension_semantics=("parallel",),
                vmem_limit_bytes=vmem_limit),
            cost_estimate=cost,
        )(labels2, table)

    try:
        # Grid-invariant table block -> single-buffer it (halves the largest
        # VMEM consumer; the matmul path is HBM-bound, not DMA-latency-bound).
        out = run_matmul(pl.Buffered(1))
    except Exception:
        # TODO(synk): some jax versions reject single-buffered BlockSpecs;
        # fall back to default double-buffering for the grid-invariant table.
        out = run_matmul(None)

    return out[:B, :H]


if __name__ == "__main__":
    # Module config (small, consistent with LabelEmbedder(num_classes, hidden, p)).
    num_classes = 16
    hidden_size = 32
    dropout_prob = 0.1
    batch = 8

    key = jax.random.PRNGKey(0)
    k_table, k_labels, k_drop = jax.random.split(key, 3)

    # nn.Embedding(num_classes + 1, hidden_size) parameters.
    table = jax.random.normal(
        k_table, (num_classes + 1, hidden_size), dtype=jnp.float32)
    labels = jax.random.randint(
        k_labels, (batch,), 0, num_classes, dtype=jnp.int32)

    # Pad the table ONCE (hot path never re-pads it in HBM).
    padded_table = pad_embedding_table(table)

    # Eval path (no dropout), VMEM one-hot matmul kernel.
    out_eval = label_embedder_forward(
        labels, padded_table, num_classes=num_classes, dropout_prob=dropout_prob,
        train=False, hidden_size=hidden_size, use_hbm_gather=False)
    out_eval = jax.block_until_ready(out_eval)
    ref_eval = jnp.take(table, labels, axis=0)
    assert out_eval.shape == (batch, hidden_size)
    assert out_eval.dtype == table.dtype
    assert jnp.allclose(out_eval, ref_eval, atol=1e-6), "eval mismatch"

    # Forced-drop path (classifier-free guidance), HBM row-gather kernel.
    force_drop_ids = (jnp.arange(batch) % 2).astype(jnp.int32)
    out_drop = label_embedder_forward(
        labels, padded_table, num_classes=num_classes, dropout_prob=dropout_prob,
        train=True, rng=k_drop, force_drop_ids=force_drop_ids,
        hidden_size=hidden_size, use_hbm_gather=True)
    out_drop = jax.block_until_ready(out_drop)
    ref_labels = jnp.where(force_drop_ids == 1, num_classes, labels)
    ref_drop = jnp.take(table, ref_labels, axis=0)
    assert out_drop.shape == (batch, hidden_size)
    assert jnp.allclose(out_drop, ref_drop, atol=1e-6), "drop mismatch"

    # Random-drop training path, auto path selection, unpadded table fallback.
    out_train = label_embedder_forward(
        labels, table, num_classes=num_classes, dropout_prob=dropout_prob,
        train=True, rng=k_drop)
    out_train = jax.block_until_ready(out_train)
    assert out_train.shape == (batch, hidden_size)

    print("KERNEL_OK")
</pallas_src>

<mosaic_0001>
module attributes {stable_mosaic.version = 11 : i64} {
  func.func @_label_embed_matmul_kernel(%arg0: i32, %arg1: memref<8x1xi32, #tpu.memory_space<vmem>>, %arg2: memref<17x128xf32, #tpu.memory_space<vmem>>, %arg3: memref<8x128xf32, #tpu.memory_space<vmem>>) attributes {dimension_semantics = [#tpu.dimension_semantics<parallel>], iteration_bounds = array<i64: 1>, scalar_prefetch = 0 : i64, scratch_operands = 0 : i64, tpu.core_type = #tpu.core_type<tc>, window_params = [{transform_indices = @transform_0, window_bounds = array<i64: 8, 1>}, {pipeline_mode = #tpu.pipeline_mode<synchronous>, transform_indices = @transform_1, window_bounds = array<i64: 17, 128>}, {transform_indices = @transform_2, window_bounds = array<i64: 8, 128>}]} {
    %c0 = arith.constant 0 : index
    %c0_0 = arith.constant 0 : index
    %0 = vector.load %arg1[%c0, %c0_0] : memref<8x1xi32, #tpu.memory_space<vmem>>, vector<8x1xi32>
    %1 = tpu.iota {dimensions = array<i32: 1>} : vector<8x17xi32>
    %2 = vector.broadcast %0 : vector<8x1xi32> to vector<8x17xi32>
    %3 = arith.cmpi eq, %1, %2 : vector<8x17xi32>
    %4 = arith.extui %3 : vector<8x17xi1> to vector<8x17xi32>
    %5 = arith.sitofp %4 : vector<8x17xi32> to vector<8x17xf32>
    %c0_1 = arith.constant 0 : index
    %c0_2 = arith.constant 0 : index
    %6 = vector.load %arg2[%c0_1, %c0_2] : memref<17x128xf32, #tpu.memory_space<vmem>>, vector<17x128xf32>
    %cst = arith.constant dense<0.000000e+00> : vector<8x128xf32>
    %7 = tpu.matmul %5, %6, %cst {dimension_numbers = #tpu.dot_dimension_numbers<[1], [0], [0], [1], [0, 0, 1, 1], [], []>} : vector<8x17xf32>, vector<17x128xf32>, vector<8x128xf32> -> vector<8x128xf32>
    %c0_3 = arith.constant 0 : index
    %c0_4 = arith.constant 0 : index
    %8 = vector.load %arg3[%c0_3, %c0_4] : memref<8x128xf32, #tpu.memory_space<vmem>>, vector<8x128xf32>
    tpu.vector_store %arg3[%c0_3, %c0_4], %7 {strides = array<i32>} : memref<8x128xf32, #tpu.memory_space<vmem>>, vector<8x128xf32>,
    return
  }
  func.func @transform_0(%arg0: i32) -> (i32, i32) {
    %c0_i32 = arith.constant 0 : i32
    %c0_i32_0 = arith.constant 0 : i32
    return %arg0, %c0_i32 : i32, i32
  }
  func.func @transform_1(%arg0: i32) -> (i32, i32) {
    %c0_i32 = arith.constant 0 : i32
    %c0_i32_0 = arith.constant 0 : i32
    %c0_i32_1 = arith.constant 0 : i32
    return %c0_i32, %c0_i32_0 : i32, i32
  }
  func.func @transform_2(%arg0: i32) -> (i32, i32) {
    %c0_i32 = arith.constant 0 : i32
    %c0_i32_0 = arith.constant 0 : i32
    return %arg0, %c0_i32 : i32, i32
  }
}

module attributes {stable_mosaic.version = 11 : i64} {
  func.func @_label_embed_matmul_kernel(%arg0: i32, %arg1: memref<8x1xi32, #tpu.memory_space<vmem>>, %arg2: memref<17x128xf32, #tpu.memory_space<vmem>>, %arg3: memref<8x128xf32, #tpu.memory_space<vmem>>) attributes {dimension_semantics = [#tpu.dimension_semantics<parallel>], iteration_bounds = array<i64: 1>, scalar_prefetch = 0 : i64, scratch_operands = 0 : i64, tpu.core_type = #tpu.core_type<tc>, window_params = [{transform_indices = @transform_0, window_bounds = array<i64: 8, 1>}, {pipeline_mode = #tpu.pipeline_mode<synchronous>, transform_indices = @transform_1, window_bounds = array<i64: 17, 128>}, {transform_indices = @transform_2, window_bounds = array<i64: 8, 128>}]} {
    %c0 = arith.constant 0 : index
    %c0_0 = arith.constant 0 : index
    %0 = vector.load %arg1[%c0, %c0_0] : memref<8x1xi32, #tpu.memory_space<vmem>>, vector<8x1xi32>
    %1 = tpu.iota {dimensions = array<i32: 1>} : vector<8x17xi32>
    %2 = vector.broadcast %0 : vector<8x1xi32> to vector<8x17xi32>
    %3 = arith.cmpi eq, %1, %2 : vector<8x17xi32>
    %4 = arith.extui %3 : vector<8x17xi1> to vector<8x17xi32>
    %5 = arith.sitofp %4 : vector<8x17xi32> to vector<8x17xf32>
    %c0_1 = arith.constant 0 : index
    %c0_2 = arith.constant 0 : index
    %6 = vector.load %arg2[%c0_1, %c0_2] : memref<17x128xf32, #tpu.memory_space<vmem>>, vector<17x128xf32>
    %cst = arith.constant dense<0.000000e+00> : vector<8x128xf32>
    %7 = tpu.matmul %5, %6, %cst {dimension_numbers = #tpu.dot_dimension_numbers<[1], [0], [0], [1], [0, 0, 1, 1], [], []>} : vector<8x17xf32>, vector<17x128xf32>, vector<8x128xf32> -> vector<8x128xf32>
    %c0_3 = arith.constant 0 : index
    %c0_4 = arith.constant 0 : index
    %8 = vector.load %arg3[%c0_3, %c0_4] : memref<8x128xf32, #tpu.memory_space<vmem>>, vector<8x128xf32>
    tpu.vector_store %arg3[%c0_3, %c0_4], %7 {strides = array<i32>} : memref<8x128xf32, #tpu.memory_space<vmem>>, vector<8x128xf32>,
    return
  }
  func.func @transform_0(%arg0: i32) -> (i32, i32) {
    %c0_i32 = arith.constant 0 : i32
    %c0_i32_0 = arith.constant 0 : i32
    return %arg0, %c0_i32 : i32, i32
  }
  func.func @transform_1(%arg0: i32) -> (i32, i32) {
    %c0_i32 = arith.constant 0 : i32
    %c0_i32_0 = arith.constant 0 : i32
    %c0_i32_1 = arith.constant 0 : i32
    return %c0_i32, %c0_i32_0 : i32, i32
  }
  func.func @transform_2(%arg0: i32) -> (i32, i32) {
    %c0_i32 = arith.constant 0 : i32
    %c0_i32_0 = arith.constant 0 : i32
    return %arg0, %c0_i32 : i32, i32
  }
}

</mosaic_0001>

<bundles_post_ra>
// kernel: tpu_custom_call.1
= control target key start
LH: loop header
LB: loop body
LE: loop exit
PB: predicated region body
PF: predicated region fallthrough
CT: control target
= control target key end

     0   :  { %7 = vsyncpa [#allocation3], 0  ;;  %s258_s0 = inlined_call_operand.vmem [shape: s32[8,1], index: 0, kind: input, shape index: {}]   ;;  %s259_s1 = inlined_call_operand.hbm [shape: f32[17,128], index: 1, kind: input, shape index: {}]   ;;  %s260_s2 = inlined_call_operand.hbm [shape: f32[8,128], index: 2, kind: output, shape index: {}]  }
   0x1   :  { %8 = vsyncpa [#allocation4], 0  ;;  %s208_s9 = smov [#allocation2]   ;;  %s160_s13 = scalar_lea.hbm %s259_s1, 384 }
   0x2   :  { %s16_s10 = sshll.u32 %s208_s9, 4  ;;  %p161_p0 = scmp.ne.s32.totalorder %s259_s1, %s160_s13  ;;  %s17_s10 = int_to_ptr.vmem [resolvable:$true] %s16_s10 }
   0x3   :  { %p164_p1 = scmp.lt.u32.totalorder %s160_s13, %s259_s1 }
   0x5   :  { %p166_p2 = pnand %p164_p1, %p161_p0 }
   0x7   :  { %169 = shalt.err (!%p166_p2)
}
   0x8   :  { %s170_s18 = scalar_lea.vmem %s17_s10, 384  ;;  %p175_p4 = scmp.lt.s32.totalorder %s17_s10, %s17_s10 }
   0x9   :  { %p171_p3 = scmp.ne.s32.totalorder %s17_s10, %s170_s18  ;;  %p176_p5 = scmp.lt.s32.totalorder %s170_s18, %s170_s18 }
   0xb   :  { %p177_p6 = por %p176_p5, %p175_p4 }
   0xd   :  { %p178_p7 = pnand %p177_p6, %p171_p3 }
   0xf   :  { %181 = shalt.err (!%p178_p7)
}
  0x10   :  { %s209_s19 = smov 128   ;;  %s210_s20 = smov 8  }
  0x11   :  { %22 = dma.hbm_to_vmem [thread:$0]  %s259_s1, 384, %s17_s10, [#allocation3], %s209_s19, %s209_s19, %s210_s20  }
  0x12   :  { %204 = dma.done.wait [#allocation3], 384  }
  0x13   :  { %205 = vsyncadd [#allocation3], 4294966912  ;;  %v211_v0 = vmov 0   ;;  %v212_v1 = vmov 0.0|0.0   ;;  %v26_v2 = vld [vmem:[%s258_s0] sm:$0xff]  ;;  %v36_v4 = vld [vmem:[#allocation2 + $0x8] sm:$0xff]  ;;  %v27_v8 = vlaneseq }
  0x14   :  { %159 = vset.pattern.permute.xlu0 %v211_v0  ;;  %148 = vmatprep.subr.bf16.mxu0 %v212_v1  ;;  %v35_v3 = vld [vmem:[#allocation2] sm:$0xff]  ;;  %vm213_vm0 = vmmov 0   ;;  %v214_v6 = vmov 0.0   ;;  %v37_v7 = vld [vmem:[#allocation2 + $0x10] sm:$0x1]  ;;  %vm42_vm1 = vcmask 1040384  }
  0x15   :  { %30 = vperm.xlu0 %159, %v26_v2   ;;  %v149_v5 = vpack.c.bf16 %v36_v4, %v35_v3  ;;  %145 = vmatprep.mubr.msk.f32.mxu0 %vm213_vm0, %v214_v6  ;;  %v28_v9 = vand.u32 127, %v27_v8  ;;  %vm38_vm2 = vcmask 138240   ;;  %s215_s0 = smov [#allocation5]  }
  0x16   :  { %s123_s1 = sshll.u32 %s215_s0, 4  ;;  %s124_s1 = int_to_ptr.vmem [resolvable:$true] %s123_s1 }
  0x17   :  { %150 = vmatpush3.bf16.msra.mxu0 %v149_v5  ;;  %s182_s25 = scalar_lea.vmem %s124_s1, 128  ;;  %p187_p9 = scmp.lt.s32.totalorder %s124_s1, %s124_s1 }
  0x18   :  { %143 = vmatprep.subr.mxu0 %v214_v6  ;;  %p183_p8 = scmp.ne.s32.totalorder %s124_s1, %s182_s25  ;;  %p188_p10 = scmp.lt.s32.totalorder %s182_s25, %s182_s25 }
  0x1a   :  { %p189_p11 = por %p188_p10, %p187_p9 }
  0x1b   :  { %144 = vmatpush3.msk.msra.mxu0 %vm42_vm1, %v37_v7 }
  0x1c   :  { %p190_p12 = pnand %p189_p11, %p183_p8 }
  0x94   :  { %v31_v10 = vpop.permute.xlu0 %30 }
  0x95   :  { %vm32_vm3 = vcmp.eq.s32.totalorder %v28_v9, %v31_v10 }
  0x96   :  { %v132_v11 = vsel %vm32_vm3, 1.0, %v214_v6 }
  0x97   :  { %146 = vmatmul.mubr.msk.f32.vlgmr.msra.gmra.mrb[0].mxu0 %vm38_vm2, %v132_v11 }
 0x16a   :  { %v112_v12 = vpop.f32.mrb[0].mxu0 }
 0x16b   :  { %116 = vst [vmem:[#allocation5] sm:$0xff] %v112_v12  ;;  %v147_v13 = vpop.f32.mrb[1].mxu0 }
 0x16c   :  { %193 = shalt.err (!%p190_p12)
}
 0x16d   :  { %s194_s28 = scalar_lea.hbm %s260_s2, 128 }
 0x16e   :  { %p195_p13 = scmp.ne.s32.totalorder %s260_s2, %s194_s28  ;;  %p198_p0 = scmp.lt.u32.totalorder %s194_s28, %s260_s2 }
 0x170   :  { %p200_p1 = pnand %p198_p0, %p195_p13 }
 0x172   :  { %203 = shalt.err (!%p200_p1)
}
 0x173   :  { %126 = dma.vmem_to_hbm [thread:$0]  %s124_s1, 128, %s260_s2, [#allocation4]  }
 0x174   :  { %206 = dma.done.wait [#allocation4], 128  }
 0x175   :  { %207 = vsyncadd [#allocation4], 4294967168 }
 0x176   :  { %130 = vsyncpa [#allocation3], 1 }
 0x177   :  { %131 = vsyncpa [#allocation4], 1 }

// kernel: tpu_custom_call.1
= control target key start
LH: loop header
LB: loop body
LE: loop exit
PB: predicated region body
PF: predicated region fallthrough
CT: control target
= control target key end

     0   :  { %7 = vsyncpa [#allocation3], 0  ;;  %s258_s0 = inlined_call_operand.vmem [shape: s32[8,1], index: 0, kind: input, shape index: {}]   ;;  %s259_s1 = inlined_call_operand.hbm [shape: f32[17,128], index: 1, kind: input, shape index: {}]   ;;  %s260_s2 = inlined_call_operand.hbm [shape: f32[8,128], index: 2, kind: output, shape index: {}]  }
   0x1   :  { %8 = vsyncpa [#allocation4], 0  ;;  %s208_s9 = smov [#allocation2]   ;;  %s160_s13 = scalar_lea.hbm %s259_s1, 384 }
   0x2   :  { %s16_s10 = sshll.u32 %s208_s9, 4  ;;  %p161_p0 = scmp.ne.s32.totalorder %s259_s1, %s160_s13  ;;  %s17_s10 = int_to_ptr.vmem [resolvable:$true] %s16_s10 }
   0x3   :  { %p164_p1 = scmp.lt.u32.totalorder %s160_s13, %s259_s1 }
   0x5   :  { %p166_p2 = pnand %p164_p1, %p161_p0 }
   0x7   :  { %169 = shalt.err (!%p166_p2)
}
   0x8   :  { %s170_s18 = scalar_lea.vmem %s17_s10, 384  ;;  %p175_p4 = scmp.lt.s32.totalorder %s17_s10, %s17_s10 }
   0x9   :  { %p171_p3 = scmp.ne.s32.totalorder %s17_s10, %s170_s18  ;;  %p176_p5 = scmp.lt.s32.totalorder %s170_s18, %s170_s18 }
   0xb   :  { %p177_p6 = por %p176_p5, %p175_p4 }
   0xd   :  { %p178_p7 = pnand %p177_p6, %p171_p3 }
   0xf   :  { %181 = shalt.err (!%p178_p7)
}
  0x10   :  { %s209_s19 = smov 128   ;;  %s210_s20 = smov 8  }
  0x11   :  { %22 = dma.hbm_to_vmem [thread:$0]  %s259_s1, 384, %s17_s10, [#allocation3], %s209_s19, %s209_s19, %s210_s20  }
  0x12   :  { %204 = dma.done.wait [#allocation3], 384  }
  0x13   :  { %205 = vsyncadd [#allocation3], 4294966912  ;;  %v211_v0 = vmov 0   ;;  %v212_v1 = vmov 0.0|0.0   ;;  %v26_v2 = vld [vmem:[%s258_s0] sm:$0xff]  ;;  %v36_v4 = vld [vmem:[#allocation2 + $0x8] sm:$0xff]  ;;  %v27_v8 = vlaneseq }
  0x14   :  { %159 = vset.pattern.permute.xlu0 %v211_v0  ;;  %148 = vmatprep.subr.bf16.mxu0 %v212_v1  ;;  %v35_v3 = vld [vmem:[#allocation2] sm:$0xff]  ;;  %vm213_vm0 = vmmov 0   ;;  %v214_v6 = vmov 0.0   ;;  %v37_v7 = vld [vmem:[#allocation2 + $0x10] sm:$0x1]  ;;  %vm42_vm1 = vcmask 1040384  }
  0x15   :  { %30 = vperm.xlu0 %159, %v26_v2   ;;  %v149_v5 = vpack.c.bf16 %v36_v4, %v35_v3  ;;  %145 = vmatprep.mubr.msk.f32.mxu0 %vm213_vm0, %v214_v6  ;;  %v28_v9 = vand.u32 127, %v27_v8  ;;  %vm38_vm2 = vcmask 138240   ;;  %s215_s0 = smov [#allocation5]  }
  0x16   :  { %s123_s1 = sshll.u32 %s215_s0, 4  ;;  %s124_s1 = int_to_ptr.vmem [resolvable:$true] %s123_s1 }
  0x17   :  { %150 = vmatpush3.bf16.msra.mxu0 %v149_v5  ;;  %s182_s25 = scalar_lea.vmem %s124_s1, 128  ;;  %p187_p9 = scmp.lt.s32.totalorder %s124_s1, %s124_s1 }
  0x18   :  { %143 = vmatprep.subr.mxu0 %v214_v6  ;;  %p183_p8 = scmp.ne.s32.totalorder %s124_s1, %s182_s25  ;;  %p188_p10 = scmp.lt.s32.totalorder %s182_s25, %s182_s25 }
  0x1a   :  { %p189_p11 = por %p188_p10, %p187_p9 }
  0x1b   :  { %144 = vmatpush3.msk.msra.mxu0 %vm42_vm1, %v37_v7 }
  0x1c   :  { %p190_p12 = pnand %p189_p11, %p183_p8 }
  0x94   :  { %v31_v10 = vpop.permute.xlu0 %30 }
  0x95   :  { %vm32_vm3 = vcmp.eq.s32.totalorder %v28_v9, %v31_v10 }
  0x96   :  { %v132_v11 = vsel %vm32_vm3, 1.0, %v214_v6 }
  0x97   :  { %146 = vmatmul.mubr.msk.f32.vlgmr.msra.gmra.mrb[0].mxu0 %vm38_vm2, %v132_v11 }
 0x16a   :  { %v112_v12 = vpop.f32.mrb[0].mxu0 }
 0x16b   :  { %116 = vst [vmem:[#allocation5] sm:$0xff] %v112_v12  ;;  %v147_v13 = vpop.f32.mrb[1].mxu0 }
 0x16c   :  { %193 = shalt.err (!%p190_p12)
}
 0x16d   :  { %s194_s28 = scalar_lea.hbm %s260_s2, 128 }
 0x16e   :  { %p195_p13 = scmp.ne.s32.totalorder %s260_s2, %s194_s28  ;;  %p198_p0 = scmp.lt.u32.totalorder %s194_s28, %s260_s2 }
 0x170   :  { %p200_p1 = pnand %p198_p0, %p195_p13 }
 0x172   :  { %203 = shalt.err (!%p200_p1)
}
 0x173   :  { %126 = dma.vmem_to_hbm [thread:$0]  %s124_s1, 128, %s260_s2, [#allocation4]  }
 0x174   :  { %206 = dma.done.wait [#allocation4], 128  }
 0x175   :  { %207 = vsyncadd [#allocation4], 4294967168 }
 0x176   :  { %130 = vsyncpa [#allocation3], 1 }
 0x177   :  { %131 = vsyncpa [#allocation4], 1 }

</bundles_post_ra>
